<compile_context>
chip_gen: v5e
topology: v5e:2x2
jax: 0.10.0
libtpu: 0.0.40
codegen_flags: <defaults>
</compile_context>

<pallas_src>
import functools

import jax
import jax.numpy as jnp
from jax.experimental import pallas as pl
from jax.experimental.pallas import tpu as pltpu

H1 = 512           # fc1 output width
H2 = 100           # fc2 output width (logical)
H2_PAD_DEFAULT = 128   # fc2 output width padded to a full lane width
                       # (A/B test 256 on v6e/v7x; keep 128 on v5e)


def _round_up(x, m):
    return (x + m - 1) // m * m


def mine_kernel(x1_ref, x2_ref, w1_ref, b1_ref, w2_ref, b2_ref, w3_ref, b3_ref,
                o_ref):
    # Build the (tm, 2*input_size) LHS in VMEM: lane-concat the two input tiles
    # (no HBM materialization of the concatenated tensor), then cast to bf16 so
    # fc1 is a single deep-K MXU matmul with f32 accumulation.
    x = jnp.concatenate([x1_ref[...], x2_ref[...]], axis=-1).astype(jnp.bfloat16)

    # fc1: one K=2*input_size bf16 MXU matmul; bias + ReLU in f32 on the VPU.
    h1 = jnp.dot(x, w1_ref[...], preferred_element_type=jnp.float32)
    h1 = jnp.maximum(h1 + b1_ref[...], 0.0)

    # fc2: lane-padded outputs (zeros beyond H2); bf16 operands, f32 accumulate.
    h2 = jnp.dot(h1.astype(jnp.bfloat16), w2_ref[...],
                 preferred_element_type=jnp.float32)
    h2 = jnp.maximum(h2 + b2_ref[...], 0.0)

    # fc3 (N=1): VPU broadcast-multiply + XLU lane reduction, off the MXU.
    # Padded lanes of h2 and w3 are zero, so the sum is exact.
    y = jnp.sum(h2 * w3_ref[...], axis=-1, keepdims=True) + b3_ref[...]
    o_ref[...] = y.astype(o_ref.dtype)


def prepare_params(params, h2_pad=H2_PAD_DEFAULT):
    """One-time weight prep: transpose to (in, out), pad fc2/fc3 outputs to
    `h2_pad` lanes, cast MXU operands to bf16.  Biases / VPU operands stay f32."""
    w1, b1 = params["w1"], params["b1"]        # (512, 2*in), (512,)
    w2, b2 = params["w2"], params["b2"]        # (100, 512),  (100,)
    w3, b3 = params["w3"], params["b3"]        # (1, 100),    (1,)

    w2_t = jnp.zeros((H1, h2_pad), jnp.float32).at[:, :H2].set(w2.T)
    b2_p = jnp.zeros((1, h2_pad), jnp.float32).at[:, :H2].set(b2)
    w3_row = jnp.zeros((1, h2_pad), jnp.float32).at[:, :H2].set(w3)

    return dict(
        w1_t=w1.T.astype(jnp.bfloat16),                 # (2*in, 512) bf16
        b1=b1.reshape(1, -1).astype(jnp.float32),       # (1, 512)    f32
        w2_t=w2_t.astype(jnp.bfloat16),                 # (512, h2p)  bf16
        b2=b2_p,                                        # (1, h2p)    f32
        w3_row=w3_row,                                  # (1, h2p)    f32 (VPU)
        b3=b3.reshape(1, 1).astype(jnp.float32),        # (1, 1)      f32
    )


def mine_forward(x1, x2, prepped, *, tm=512):
    """Fused Pallas forward of Mine. x1, x2: (B, input_size) f32 -> (B, 1) f32."""
    assert x1.shape == x2.shape, (x1.shape, x2.shape)
    B, d_in = x1.shape

    w1_t, b1 = prepped["w1_t"], prepped["b1"]
    w2_t, b2 = prepped["w2_t"], prepped["b2"]
    w3_row, b3 = prepped["w3_row"], prepped["b3"]
    d_in2 = w1_t.shape[0]          # 2 * input_size
    h1 = w1_t.shape[1]             # 512
    h2p = w2_t.shape[1]            # padded fc2 width (128 by default)
    assert d_in2 == 2 * d_in, (d_in2, d_in)

    # Batch tile:
    #  * large tiles (default 512) so the ~0.35 us per-grid-step cost is hidden,
    #  * ~ceil(B/2) rounded to 16 so the grid has >= 2 steps whenever B > 16
    #    (lets dimension_semantics=("parallel",) use both v7x TensorCores),
    #  * never bigger than round_up(B, 8) so tiny batches stay single-block.
    # No batch padding: the last grid tile may be ragged; OOB rows are
    # undefined but independent and their stores are dropped.
    tm_eff = max(8, min(tm,
                        _round_up(pl.cdiv(B, 2), 16),
                        _round_up(B, 8)))
    grid = (pl.cdiv(B, tm_eff),)

    weight_bytes = (w1_t.size * 2 + w2_t.size * 2
                    + (b1.size + b2.size + w3_row.size + b3.size) * 4)
    cost = pl.CostEstimate(
        flops=2 * B * (d_in2 * h1 + h1 * h2p + h2p),
        transcendentals=0,
        bytes_accessed=int(B * d_in2 * 4 + weight_bytes + B * 4),
    )

    out = pl.pallas_call(
        mine_kernel,
        out_shape=jax.ShapeDtypeStruct((B, 1), jnp.float32),
        grid=grid,
        in_specs=[
            # Activations: tiled over the batch, double-buffered by BlockSpec.
            pl.BlockSpec((tm_eff, d_in), lambda i: (i, 0)),   # x1
            pl.BlockSpec((tm_eff, d_in), lambda i: (i, 0)),   # x2
            # Weights / biases: constant index_map -> VMEM-resident across steps.
            pl.BlockSpec((d_in2, h1), lambda i: (0, 0)),      # W1^T (bf16)
            pl.BlockSpec((1, h1), lambda i: (0, 0)),          # b1   (f32)
            pl.BlockSpec((h1, h2p), lambda i: (0, 0)),        # W2^T (bf16, padded)
            pl.BlockSpec((1, h2p), lambda i: (0, 0)),         # b2   (f32, padded)
            pl.BlockSpec((1, h2p), lambda i: (0, 0)),         # w3   (f32, padded)
            pl.BlockSpec((1, 1), lambda i: (0, 0)),           # b3   (f32)
        ],
        out_specs=pl.BlockSpec((tm_eff, 1), lambda i: (i, 0)),
        compiler_params=pltpu.CompilerParams(
            dimension_semantics=("parallel",)),
        cost_estimate=cost,
    )(x1, x2, w1_t, b1, w2_t, b2, w3_row, b3)
    return out


def init_params(key, input_size):
    """Deterministic init mirroring nn.Linear default shapes."""
    def linear(key, fan_in, fan_out):
        kw, kb = jax.random.split(key)
        bound = 1.0 / jnp.sqrt(fan_in)
        w = jax.random.uniform(kw, (fan_out, fan_in), jnp.float32, -bound, bound)
        b = jax.random.uniform(kb, (fan_out,), jnp.float32, -bound, bound)
        return w, b

    k1, k2, k3 = jax.random.split(key, 3)
    w1, b1 = linear(k1, input_size * 2, H1)
    w2, b2 = linear(k2, H1, H2)
    w3, b3 = linear(k3, H2, 1)
    return dict(w1=w1, b1=b1, w2=w2, b2=b2, w3=w3, b3=b3)


def mine_reference(x1, x2, params):
    """Plain-JAX f32 reference (matches the PyTorch forward exactly)."""
    x = jnp.concatenate([x1, x2], axis=1)
    h = jax.nn.relu(x @ params["w1"].T + params["b1"])
    h = jax.nn.relu(h @ params["w2"].T + params["b2"])
    return h @ params["w3"].T + params["b3"]


def mine_reference_bf16(x1, x2, params):
    """Reference mimicking the kernel's bf16-operand / f32-accumulate math."""
    x = jnp.concatenate([x1, x2], axis=1).astype(jnp.bfloat16)
    h = jnp.dot(x, params["w1"].T.astype(jnp.bfloat16),
                preferred_element_type=jnp.float32)
    h = jnp.maximum(h + params["b1"], 0.0)
    h = jnp.dot(h.astype(jnp.bfloat16), params["w2"].T.astype(jnp.bfloat16),
                preferred_element_type=jnp.float32)
    h = jnp.maximum(h + params["b2"], 0.0)
    return jnp.sum(h * params["w3"], axis=-1, keepdims=True) + params["b3"]


def _check(out, x1, x2, params):
    ref_bf16 = mine_reference_bf16(x1, x2, params)
    assert jnp.allclose(out, ref_bf16, atol=2e-3, rtol=2e-3), (
        float(jnp.max(jnp.abs(out - ref_bf16))))
    ref_f32 = mine_reference(x1, x2, params)
    assert jnp.allclose(out, ref_f32, atol=3e-2, rtol=3e-2), (
        float(jnp.max(jnp.abs(out - ref_f32))))


if __name__ == "__main__":
    key = jax.random.PRNGKey(0)
    k_p, k_x1, k_x2, k_y1, k_y2 = jax.random.split(key, 5)

    INPUT_SIZE = 32
    params = init_params(k_p, INPUT_SIZE)
    prepped = prepare_params(params)
    fwd = jax.jit(functools.partial(mine_forward, prepped=prepped))

    # Small batch: single grid step, block equals the full (8-row) batch.
    B = 8
    x1 = jax.random.normal(k_x1, (B, INPUT_SIZE), jnp.float32)
    x2 = jax.random.normal(k_x2, (B, INPUT_SIZE), jnp.float32)
    out = jax.block_until_ready(fwd(x1, x2))
    assert out.shape == (B, 1), out.shape
    _check(out, x1, x2, params)

    # Slightly larger batch: exercises the multi-step grid with a ragged
    # last tile (no wrapper-side padding).
    B2 = 40
    y1 = jax.random.normal(k_y1, (B2, INPUT_SIZE), jnp.float32)
    y2 = jax.random.normal(k_y2, (B2, INPUT_SIZE), jnp.float32)
    out2 = jax.block_until_ready(fwd(y1, y2))
    assert out2.shape == (B2, 1), out2.shape
    _check(out2, y1, y2, params)

    print("KERNEL_OK")
</pallas_src>

<mosaic_0001>
module attributes {stable_mosaic.version = 11 : i64} {
  func.func @mine_kernel(%arg0: i32, %arg1: memref<8x32xf32, #tpu.memory_space<vmem>>, %arg2: memref<8x32xf32, #tpu.memory_space<vmem>>, %arg3: memref<64x512xbf16, #tpu.memory_space<vmem>>, %arg4: memref<1x512xf32, #tpu.memory_space<vmem>>, %arg5: memref<512x128xbf16, #tpu.memory_space<vmem>>, %arg6: memref<1x128xf32, #tpu.memory_space<vmem>>, %arg7: memref<1x128xf32, #tpu.memory_space<vmem>>, %arg8: memref<1x1xf32, #tpu.memory_space<vmem>>, %arg9: memref<8x1xf32, #tpu.memory_space<vmem>>) attributes {dimension_semantics = [#tpu.dimension_semantics<parallel>], iteration_bounds = array<i64: 1>, scalar_prefetch = 0 : i64, scratch_operands = 0 : i64, tpu.core_type = #tpu.core_type<tc>, window_params = [{transform_indices = @transform_0, window_bounds = array<i64: 8, 32>}, {transform_indices = @transform_1, window_bounds = array<i64: 8, 32>}, {pipeline_mode = #tpu.pipeline_mode<synchronous>, transform_indices = @transform_2, window_bounds = array<i64: 64, 512>}, {pipeline_mode = #tpu.pipeline_mode<synchronous>, transform_indices = @transform_3, window_bounds = array<i64: 1, 512>}, {pipeline_mode = #tpu.pipeline_mode<synchronous>, transform_indices = @transform_4, window_bounds = array<i64: 512, 128>}, {pipeline_mode = #tpu.pipeline_mode<synchronous>, transform_indices = @transform_5, window_bounds = array<i64: 1, 128>}, {pipeline_mode = #tpu.pipeline_mode<synchronous>, transform_indices = @transform_6, window_bounds = array<i64: 1, 128>}, {pipeline_mode = #tpu.pipeline_mode<synchronous>, transform_indices = @transform_7, window_bounds = array<i64: 1, 1>}, {transform_indices = @transform_8, window_bounds = array<i64: 8, 1>}]} {
    %c0 = arith.constant 0 : index
    %c0_0 = arith.constant 0 : index
    %0 = vector.load %arg1[%c0, %c0_0] : memref<8x32xf32, #tpu.memory_space<vmem>>, vector<8x32xf32>
    %c0_1 = arith.constant 0 : index
    %c0_2 = arith.constant 0 : index
    %1 = vector.load %arg2[%c0_1, %c0_2] : memref<8x32xf32, #tpu.memory_space<vmem>>, vector<8x32xf32>
    %2 = tpu.concatenate %0, %1 in 1 : vector<8x32xf32>, vector<8x32xf32> -> vector<8x64xf32>
    %3 = arith.truncf %2 : vector<8x64xf32> to vector<8x64xbf16>
    %c0_3 = arith.constant 0 : index
    %c0_4 = arith.constant 0 : index
    %4 = vector.load %arg3[%c0_3, %c0_4] : memref<64x512xbf16, #tpu.memory_space<vmem>>, vector<64x512xbf16>
    %cst = arith.constant dense<0.000000e+00> : vector<8x512xf32>
    %5 = tpu.matmul %3, %4, %cst {dimension_numbers = #tpu.dot_dimension_numbers<[1], [0], [0], [1], [0, 0, 1, 1], [], []>} : vector<8x64xbf16>, vector<64x512xbf16>, vector<8x512xf32> -> vector<8x512xf32>
    %c0_5 = arith.constant 0 : index
    %c0_6 = arith.constant 0 : index
    %6 = vector.load %arg4[%c0_5, %c0_6] : memref<1x512xf32, #tpu.memory_space<vmem>>, vector<1x512xf32>
    %7 = vector.broadcast %6 : vector<1x512xf32> to vector<8x512xf32>
    %8 = arith.addf %5, %7 : vector<8x512xf32>
    %cst_7 = arith.constant 0.000000e+00 : f32
    %9 = vector.broadcast %cst_7 : f32 to vector<8x512xf32>
    %10 = arith.maximumf %8, %9 : vector<8x512xf32>
    %11 = arith.truncf %10 : vector<8x512xf32> to vector<8x512xbf16>
    %c0_8 = arith.constant 0 : index
    %c0_9 = arith.constant 0 : index
    %12 = vector.load %arg5[%c0_8, %c0_9] : memref<512x128xbf16, #tpu.memory_space<vmem>>, vector<512x128xbf16>
    %cst_10 = arith.constant dense<0.000000e+00> : vector<8x128xf32>
    %13 = tpu.matmul %11, %12, %cst_10 {dimension_numbers = #tpu.dot_dimension_numbers<[1], [0], [0], [1], [0, 0, 1, 1], [], []>} : vector<8x512xbf16>, vector<512x128xbf16>, vector<8x128xf32> -> vector<8x128xf32>
    %c0_11 = arith.constant 0 : index
    %c0_12 = arith.constant 0 : index
    %14 = vector.load %arg6[%c0_11, %c0_12] : memref<1x128xf32, #tpu.memory_space<vmem>>, vector<1x128xf32>
    %15 = vector.broadcast %14 : vector<1x128xf32> to vector<8x128xf32>
    %16 = arith.addf %13, %15 : vector<8x128xf32>
    %cst_13 = arith.constant 0.000000e+00 : f32
    %17 = vector.broadcast %cst_13 : f32 to vector<8x128xf32>
    %18 = arith.maximumf %16, %17 : vector<8x128xf32>
    %c0_14 = arith.constant 0 : index
    %c0_15 = arith.constant 0 : index
    %19 = vector.load %arg7[%c0_14, %c0_15] : memref<1x128xf32, #tpu.memory_space<vmem>>, vector<1x128xf32>
    %20 = vector.broadcast %19 : vector<1x128xf32> to vector<8x128xf32>
    %21 = arith.mulf %18, %20 : vector<8x128xf32>
    %cst_16 = arith.constant dense<0.000000e+00> : vector<8xf32>
    %22 = vector.multi_reduction <add>, %21, %cst_16 [1] : vector<8x128xf32> to vector<8xf32>
    %23 = vector.shape_cast %22 : vector<8xf32> to vector<8x1xf32>
    %c0_17 = arith.constant 0 : index
    %c0_18 = arith.constant 0 : index
    %24 = vector.load %arg8[%c0_17, %c0_18] : memref<1x1xf32, #tpu.memory_space<vmem>>, vector<1x1xf32>
    %25 = vector.broadcast %24 : vector<1x1xf32> to vector<8x1xf32>
    %26 = arith.addf %23, %25 : vector<8x1xf32>
    %c0_19 = arith.constant 0 : index
    %c0_20 = arith.constant 0 : index
    %27 = vector.load %arg9[%c0_19, %c0_20] : memref<8x1xf32, #tpu.memory_space<vmem>>, vector<8x1xf32>
    tpu.vector_store %arg9[%c0_19, %c0_20], %26 {strides = array<i32>} : memref<8x1xf32, #tpu.memory_space<vmem>>, vector<8x1xf32>,
    return
  }
  func.func @transform_0(%arg0: i32) -> (i32, i32) {
    %c0_i32 = arith.constant 0 : i32
    %c0_i32_0 = arith.constant 0 : i32
    return %arg0, %c0_i32 : i32, i32
  }
  func.func @transform_1(%arg0: i32) -> (i32, i32) {
    %c0_i32 = arith.constant 0 : i32
    %c0_i32_0 = arith.constant 0 : i32
    return %arg0, %c0_i32 : i32, i32
  }
  func.func @transform_2(%arg0: i32) -> (i32, i32) {
    %c0_i32 = arith.constant 0 : i32
    %c0_i32_0 = arith.constant 0 : i32
    %c0_i32_1 = arith.constant 0 : i32
    return %c0_i32, %c0_i32_0 : i32, i32
  }
  func.func @transform_3(%arg0: i32) -> (i32, i32) {
    %c0_i32 = arith.constant 0 : i32
    %c0_i32_0 = arith.constant 0 : i32
    %c0_i32_1 = arith.constant 0 : i32
    return %c0_i32, %c0_i32_0 : i32, i32
  }
  func.func @transform_4(%arg0: i32) -> (i32, i32) {
    %c0_i32 = arith.constant 0 : i32
    %c0_i32_0 = arith.constant 0 : i32
    %c0_i32_1 = arith.constant 0 : i32
    return %c0_i32, %c0_i32_0 : i32, i32
  }
  func.func @transform_5(%arg0: i32) -> (i32, i32) {
    %c0_i32 = arith.constant 0 : i32
    %c0_i32_0 = arith.constant 0 : i32
    %c0_i32_1 = arith.constant 0 : i32
    return %c0_i32, %c0_i32_0 : i32, i32
  }
  func.func @transform_6(%arg0: i32) -> (i32, i32) {
    %c0_i32 = arith.constant 0 : i32
    %c0_i32_0 = arith.constant 0 : i32
    %c0_i32_1 = arith.constant 0 : i32
    return %c0_i32, %c0_i32_0 : i32, i32
  }
  func.func @transform_7(%arg0: i32) -> (i32, i32) {
    %c0_i32 = arith.constant 0 : i32
    %c0_i32_0 = arith.constant 0 : i32
    %c0_i32_1 = arith.constant 0 : i32
    return %c0_i32, %c0_i32_0 : i32, i32
  }
  func.func @transform_8(%arg0: i32) -> (i32, i32) {
    %c0_i32 = arith.constant 0 : i32
    %c0_i32_0 = arith.constant 0 : i32
    return %arg0, %c0_i32 : i32, i32
  }
}

</mosaic_0001>

<bundles_post_ra>
// kernel: mine_forward.1
= control target key start
LH: loop header
LB: loop body
LE: loop exit
PB: predicated region body
PF: predicated region fallthrough
CT: control target
= control target key end

     0   :  { %s1082_s0 = inlined_call_operand.hbm [shape: f32[8,32], index: 0, kind: input, shape index: {}]   ;;  %s1083_s1 = inlined_call_operand.hbm [shape: f32[8,32], index: 1, kind: input, shape index: {}]   ;;  %s1084_s2 = inlined_call_operand.hbm [shape: bf16[64,512], index: 2, kind: input, shape index: {}]   ;;  %s1085_s3 = inlined_call_operand.hbm [shape: f32[1,512], index: 3, kind: input, shape index: {}]   ;;  %s1086_s4 = inlined_call_operand.hbm [shape: bf16[512,128], index: 4, kind: input, shape index: {}]   ;;  %s1087_s5 = inlined_call_operand.vmem [shape: f32[1,128], index: 5, kind: input, shape index: {}]   ;;  %s1088_s6 = inlined_call_operand.vmem [shape: f32[1,128], index: 6, kind: input, shape index: {}]   ;;  %s1089_s7 = inlined_call_operand.<no memory space> [shape: f32[1,1], index: 7, kind: input, shape index: {}]   ;;  %s1090_s8 = inlined_call_operand.vmem [shape: f32[8,1], index: 8, kind: output, shape index: {}]  }
   0x1   :  { %v13_v0 = vstv %s1089_s7 }
   0x2   :  { %14 = vst [vmem:[#allocation2] sm:$0x1] %v13_v0 }
   0x3   :  { %15 = vsyncpa [#allocation4], 0 }
   0x4   :  { %16 = vsyncpa [#allocation6], 0  ;;  %s34_s9 = sshll.u32 %s1083_s1, 4  ;;  %s35_s9 = int_to_ptr.hbm [resolvable:$true] %s34_s9 }
   0x5   :  { %17 = vsyncpa [#allocation9], 0  ;;  %s1000_s10 = smov [#allocation5]   ;;  %s58_s14 = sshll.u32 %s1085_s3, 4  ;;  %s59_s14 = int_to_ptr.hbm [resolvable:$true] %s58_s14 }
   0x6   :  { %s36_s11 = sshll.u32 %s1000_s10, 4  ;;  %s1001_s15 = smov [#allocation8]   ;;  %s37_s11 = int_to_ptr.vmem [resolvable:$true] %s36_s11 }
   0x7   :  { %39 = dma.hbm_to_vmem [thread:$0]  %s35_s9, 128, %s37_s11, [#allocation6]  }
   0x8   :  { %s60_s7 = sshll.u32 %s1001_s15, 4  ;;  %s23_s18 = sshll.u32 %s1082_s0, 4  ;;  %s61_s7 = int_to_ptr.vmem [resolvable:$true] %s60_s7  ;;  %s24_s18 = int_to_ptr.hbm [resolvable:$true] %s23_s18 }
   0x9   :  { %63 = dma.hbm_to_vmem [thread:$0]  %s59_s14, 64, %s61_s7, [#allocation9]  }
   0xa   :  { %s44_s20 = sshll.u32 %s1084_s2, 4  ;;  %s1002_s21 = smov [#allocation3]   ;;  %s45_s20 = int_to_ptr.hbm [resolvable:$true] %s44_s20 }
   0xb   :  { %s25_s22 = sshll.u32 %s1002_s21, 4  ;;  %s1003_s3 = smov [#allocation7]   ;;  %s26_s22 = int_to_ptr.vmem [resolvable:$true] %s25_s22 }
   0xc   :  { %28 = dma.hbm_to_vmem [thread:$0]  %s24_s18, 128, %s26_s22, [#allocation4]  }
   0xd   :  { %s46_s23 = sshll.u32 %s1003_s3, 4  ;;  %s1004_s24 = smov 256   ;;  %s47_s23 = int_to_ptr.vmem [resolvable:$true] %s46_s23 }
   0xe   :  { %s1005_s25 = smov 16   ;;  %s68_s27 = sshll.u32 %s1086_s4, 4  ;;  %s69_s27 = int_to_ptr.hbm [resolvable:$true] %s68_s27 }
   0xf   :  { %52 = dma.hbm_to_vmem [thread:$0]  %s45_s20, 2048, %s47_s23, [#allocation6], %s1004_s24, %s1004_s24, %s1005_s25  }
  0x10   :  { %s1006_s28 = smov [#allocation10]   ;;  %s1007_s2 = smov 64  }
  0x11   :  { %s70_s29 = sshll.u32 %s1006_s28, 4  ;;  %s1008_s30 = smov 4   ;;  %s71_s29 = int_to_ptr.vmem [resolvable:$true] %s70_s29 }
  0x12   :  { %76 = dma.hbm_to_vmem [thread:$0]  %s69_s27, 4096, %s71_s29, [#allocation9], %s1007_s2, %s1007_s2, %s1008_s30  }
  0x13   :  { %994 = dma.done.wait [#allocation4], 128  }
  0x14   :  { %995 = vsyncadd [#allocation4], 4294967168 }
  0x15   :  { %996 = dma.done.wait [#allocation6], 2176  }
  0x16   :  { %997 = vsyncadd [#allocation6], 4294965120 }
  0x17   :  { %998 = dma.done.wait [#allocation9], 4160  }
  0x18   :  { %999 = vsyncadd [#allocation9], 4294963136  ;;  %v105_v1 = vld [vmem:[#allocation5] sm:$0xff]  ;;  %v667_v2 = vld [vmem:[#allocation7 + $0x60] sm:$0xf]  ;;  %s1009_s9 = smov 32  }
  0x19   :  { %v827_v3 = vld [vmem:[#allocation7 + $0x6c] sm:$0xf0]  ;;  %107 = vrot.lane.b32.xlu0 %v105_v1, %s1009_s9  ;;  %v825_v5 = vld [vmem:[#allocation7 + $0x64] sm:$0xf]  ;;  %v669_v6 = vld [vmem:[#allocation7 + $0x70] sm:$0xf0] }
  0x1a   :  { %v668_v4 = vor.u32 %v827_v3, %v667_v2  ;;  %v675_v7 = vld [vmem:[#allocation7 + $0x68] sm:$0xf]  ;;  %v672_v8 = vor.u32 %v825_v5, %v669_v6  ;;  %v828_v9 = vld [vmem:[#allocation7 + $0x74] sm:$0xf0]  ;;  %v826_v10 = vld [vmem:[#allocation7 + $0x6c] sm:$0xf] }
  0x1b   :  { %v677_v11 = vld [vmem:[#allocation7 + $0x78] sm:$0xf0]  ;;  %v676_v12 = vor.u32 %v828_v9, %v675_v7  ;;  %v651_v14 = vld [vmem:[#allocation7 + $0x40] sm:$0xf]  ;;  %v823_v15 = vld [vmem:[#allocation7 + $0x4c] sm:$0xf0] }
  0x1c   :  { %227 = vmatpush.bf16.msra.mxu0 %v668_v4  ;;  %v680_v13 = vor.u32 %v826_v10, %v677_v11  ;;  %v821_v16 = vld [vmem:[#allocation7 + $0x44] sm:$0xf]  ;;  %240 = vmatpush.bf16.msra.mxu1 %v672_v8  ;;  %v652_v17 = vor.u32 %v823_v15, %v651_v14  ;;  %v653_v18 = vld [vmem:[#allocation7 + $0x50] sm:$0xf0]  ;;  %v659_v19 = vld [vmem:[#allocation7 + $0x48] sm:$0xf] }
  0x1d   :  { %v824_v20 = vld [vmem:[#allocation7 + $0x54] sm:$0xf0]  ;;  %253 = vmatpush.bf16.msra.mxu2 %v676_v12  ;;  %v656_v21 = vor.u32 %v821_v16, %v653_v18  ;;  %v822_v23 = vld [vmem:[#allocation7 + $0x4c] sm:$0xf]  ;;  %v661_v24 = vld [vmem:[#allocation7 + $0x58] sm:$0xf0] }
  0x1e   :  { %266 = vmatpush.bf16.msra.mxu3 %v680_v13  ;;  %v660_v22 = vor.u32 %v824_v20, %v659_v19  ;;  %v635_v25 = vld [vmem:[#allocation7 + $0x20] sm:$0xf]  ;;  %v664_v26 = vor.u32 %v822_v23, %v661_v24  ;;  %v819_v27 = vld [vmem:[#allocation7 + $0x2c] sm:$0xf0]  ;;  %v817_v28 = vld [vmem:[#allocation7 + $0x24] sm:$0xf] }
  0x1f   :  { %v637_v29 = vld [vmem:[#allocation7 + $0x30] sm:$0xf0]  ;;  %v636_v30 = vor.u32 %v819_v27, %v635_v25  ;;  %v643_v31 = vld [vmem:[#allocation7 + $0x28] sm:$0xf]  ;;  %v820_v32 = vld [vmem:[#allocation7 + $0x34] sm:$0xf0] }
  0x20   :  { %228 = vmatpush.bf16.msra.mxu0 %v652_v17  ;;  %v818_v33 = vld [vmem:[#allocation7 + $0x2c] sm:$0xf]  ;;  %241 = vmatpush.bf16.msra.mxu1 %v656_v21  ;;  %v640_v34 = vor.u32 %v817_v28, %v637_v29  ;;  %v645_v35 = vld [vmem:[#allocation7 + $0x38] sm:$0xf0]  ;;  %v644_v36 = vor.u32 %v820_v32, %v643_v31  ;;  %v619_v38 = vld [vmem:[#allocation7] sm:$0xf] }
  0x21   :  { %254 = vmatpush.bf16.msra.mxu2 %v660_v22  ;;  %v648_v37 = vor.u32 %v818_v33, %v645_v35  ;;  %v815_v39 = vld [vmem:[#allocation7 + $0xc] sm:$0xf0]  ;;  %v813_v40 = vld [vmem:[#allocation7 + $0x4] sm:$0xf]  ;;  %v621_v42 = vld [vmem:[#allocation7 + $0x10] sm:$0xf0] }
  0x22   :  { %267 = vmatpush.bf16.msra.mxu3 %v664_v26  ;;  %v620_v41 = vor.u32 %v815_v39, %v619_v38  ;;  %v627_v43 = vld [vmem:[#allocation7 + $0x8] sm:$0xf]  ;;  %v816_v44 = vld [vmem:[#allocation7 + $0x14] sm:$0xf0]  ;;  %v624_v45 = vor.u32 %v813_v40, %v621_v42  ;;  %v814_v47 = vld [vmem:[#allocation7 + $0xc] sm:$0xf] }
  0x23   :  { %v628_v46 = vor.u32 %v816_v44, %v627_v43  ;;  %v629_v48 = vld [vmem:[#allocation7 + $0x18] sm:$0xf0]  ;;  %v835_v54 = vld [vmem:[#allocation10 + $0x30] sm:$0xff]  ;;  %v834_v58 = vld [vmem:[#allocation10 + $0x28] sm:$0xff]  ;;  %vm110_vm0 = vcmask 261120   ;;  %vm219_vm1 = vcmask 523264  }
  0x24   :  { %229 = vmatpush.bf16.msra.mxu0 %v636_v30  ;;  %242 = vmatpush.bf16.msra.mxu1 %v640_v34  ;;  %v632_v49 = vor.u32 %v814_v47, %v629_v48  ;;  %v836_v50 = vld [vmem:[#allocation10 + $0x38] sm:$0xff]  ;;  %v843_v55 = vld [vmem:[#allocation10 + $0x70] sm:$0xff]  ;;  %v842_v59 = vld [vmem:[#allocation10 + $0x68] sm:$0xff]  ;;  %vm608_vm2 = vcmask 7168  }
  0x25   :  { %255 = vmatpush.bf16.msra.mxu2 %v644_v36  ;;  %v844_v51 = vld [vmem:[#allocation10 + $0x78] sm:$0xff]  ;;  %v851_v56 = vld [vmem:[#allocation10 + $0xb0] sm:$0xff]  ;;  %v850_v60 = vld [vmem:[#allocation10 + $0xa8] sm:$0xff] }
  0x26   :  { %268 = vmatpush.bf16.msra.mxu3 %v648_v37  ;;  %v852_v52 = vld [vmem:[#allocation10 + $0xb8] sm:$0xff]  ;;  %v859_v57 = vld [vmem:[#allocation10 + $0xf0] sm:$0xff]  ;;  %v858_v61 = vld [vmem:[#allocation10 + $0xe8] sm:$0xff] }
  0x27   :  { %v860_v53 = vld [vmem:[#allocation10 + $0xf8] sm:$0xff]  ;;  %v833_v62 = vld [vmem:[#allocation10 + $0x20] sm:$0xff]  ;;  %v831_v6 = vld [vmem:[#allocation10 + $0x10] sm:$0xff] }
  0x28   :  { %230 = vmatpush.bf16.msra.mxu0 %v620_v41  ;;  %243 = vmatpush.bf16.msra.mxu1 %v624_v45  ;;  %v841_v63 = vld [vmem:[#allocation10 + $0x60] sm:$0xff]  ;;  %v832_v2 = vld [vmem:[#allocation10 + $0x18] sm:$0xff]  ;;  %v839_v7 = vld [vmem:[#allocation10 + $0x50] sm:$0xff] }
  0x29   :  { %256 = vmatpush.bf16.msra.mxu2 %v628_v46  ;;  %v849_v0 = vld [vmem:[#allocation10 + $0xa0] sm:$0xff]  ;;  %v840_v3 = vld [vmem:[#allocation10 + $0x58] sm:$0xff]  ;;  %v104_v8 = vld [vmem:[#allocation3] sm:$0xff] }
  0x2a   :  { %269 = vmatpush.bf16.msra.mxu3 %v632_v49  ;;  %v857_v1 = vld [vmem:[#allocation10 + $0xe0] sm:$0xff]  ;;  %v848_v4 = vld [vmem:[#allocation10 + $0x98] sm:$0xff]  ;;  %v830_v12 = vld [vmem:[#allocation10 + $0x8] sm:$0xff] }
  0x2b   :  { %v856_v5 = vld [vmem:[#allocation10 + $0xd8] sm:$0xff]  ;;  %v838_v13 = vld [vmem:[#allocation10 + $0x48] sm:$0xff]  ;;  %v847_v14 = vld [vmem:[#allocation10 + $0x90] sm:$0xff] }
  0x2c   :  { %543 = vmatpush.bf16.msrb.mxu0 %v836_v50  ;;  %556 = vmatpush.bf16.msrb.mxu1 %v844_v51  ;;  %v855_v15 = vld [vmem:[#allocation10 + $0xd0] sm:$0xff]  ;;  %v829_v16 = vld [vmem:[#allocation10] sm:$0xff]  ;;  %v846_v18 = vld [vmem:[#allocation10 + $0x88] sm:$0xff] }
  0x2d   :  { %569 = vmatpush.bf16.msrb.mxu2 %v852_v52  ;;  %v837_v17 = vld [vmem:[#allocation10 + $0x40] sm:$0xff]  ;;  %v854_v19 = vld [vmem:[#allocation10 + $0xc8] sm:$0xff]  ;;  %v129_v22 = vld [vmem:[#allocation8] sm:$0xf] }
  0x2e   :  { %582 = vmatpush.bf16.msrb.mxu3 %v860_v53  ;;  %v845_v20 = vld [vmem:[#allocation10 + $0x80] sm:$0xff]  ;;  %v131_v23 = vperm.slane %v129_v22, 0  ;;  %v132_v24 = vperm.slane %v129_v22, 1  ;;  %v133_v31 = vperm.slane %v129_v22, 2  ;;  %v134_v32 = vperm.slane %v129_v22, 3 }
  0x2f   :  { %v853_v21 = vld [vmem:[#allocation10 + $0xc0] sm:$0xff]  ;;  %v871_v49 = vld [vmem:[%s1087_s5] ss:$0 sm:$0xff] }
  0x30   :  { %544 = vmatpush.bf16.msrb.mxu0 %v835_v54  ;;  %557 = vmatpush.bf16.msrb.mxu1 %v843_v55 }
  0x31   :  { %570 = vmatpush.bf16.msrb.mxu2 %v851_v56 }
  0x32   :  { %583 = vmatpush.bf16.msrb.mxu3 %v859_v57 }
  0x34   :  { %545 = vmatpush.bf16.msrb.mxu0 %v834_v58  ;;  %558 = vmatpush.bf16.msrb.mxu1 %v842_v59  ;;  %v872_v58 = vld [vmem:[%s1088_s6] ss:$0 sm:$0xff] }
  0x35   :  { %571 = vmatpush.bf16.msrb.mxu2 %v850_v60 }
  0x36   :  { %584 = vmatpush.bf16.msrb.mxu3 %v858_v61 }
  0x38   :  { %546 = vmatpush.bf16.msrb.mxu0 %v833_v62  ;;  %559 = vmatpush.bf16.msrb.mxu1 %v841_v63  ;;  %v873_v63 = vld [vmem:[#allocation2] ss:$0 sm:$0xff] }
  0x39   :  { %572 = vmatpush.bf16.msrb.mxu2 %v849_v0 }
  0x3a   :  { %585 = vmatpush.bf16.msrb.mxu3 %v857_v1 }
  0x3c   :  { %547 = vmatpush.bf16.msrb.mxu0 %v832_v2  ;;  %560 = vmatpush.bf16.msrb.mxu1 %v840_v3 }
  0x3d   :  { %573 = vmatpush.bf16.msrb.mxu2 %v848_v4 }
  0x3e   :  { %586 = vmatpush.bf16.msrb.mxu3 %v856_v5 }
  0x40   :  { %548 = vmatpush.bf16.msrb.mxu0 %v831_v6  ;;  %561 = vmatpush.bf16.msrb.mxu1 %v839_v7 }
  0x41   :  { %574 = vmatpush.bf16.msrb.mxu2 %v847_v14 }
  0x42   :  { %587 = vmatpush.bf16.msrb.mxu3 %v855_v15 }
  0x44   :  { %549 = vmatpush.bf16.msrb.mxu0 %v830_v12  ;;  %562 = vmatpush.bf16.msrb.mxu1 %v838_v13 }
  0x45   :  { %575 = vmatpush.bf16.msrb.mxu2 %v846_v18 }
  0x46   :  { %588 = vmatpush.bf16.msrb.mxu3 %v854_v19 }
  0x48   :  { %550 = vmatpush.bf16.msrb.mxu0 %v829_v16  ;;  %563 = vmatpush.bf16.msrb.mxu1 %v837_v17 }
  0x49   :  { %576 = vmatpush.bf16.msrb.mxu2 %v845_v20 }
  0x4a   :  { %589 = vmatpush.bf16.msrb.mxu3 %v853_v21 }
  0x8b   :  { %v108_v9 = vpop.permute.xlu0 %107 }
  0x8c   :  { %v111_v10 = vsel %vm110_vm0, %v104_v8, %v108_v9 }
  0x8d   :  { %v112_v11 = vpack.c.bf16 %v111_v10, %v111_v10 }
  0x8f   :  { %681 = vmatmul.msk.bf16.vlgmr.msra.gmra.mxu0 %vm219_vm1, %v112_v11  ;;  %682 = vmatmul.msk.bf16.vlgmr.msra.gmra.mxu1 %vm219_vm1, %v112_v11 }
  0x90   :  { %683 = vmatmul.msk.bf16.vlgmr.msra.gmra.mxu2 %vm219_vm1, %v112_v11  ;;  %684 = vmatmul.msk.bf16.vlgmr.msra.gmra.mxu3 %vm219_vm1, %v112_v11 }
 0x10c   :  { %v232_v25 = vpop.f32.mrf.mxu0  ;;  %v245_v26 = vpop.f32.mrf.mxu1 }
 0x10d   :  { %v233_v27 = vadd.f32 %v232_v25, %v131_v23  ;;  %v246_v28 = vadd.f32 %v245_v26, %v132_v24 }
 0x10f   :  { %v275_v29 = vmax.f32 %v233_v27, 0.0  ;;  %v276_v30 = vmax.f32 %v246_v28, 0.0 }
 0x111   :  { %v279_v33 = vpack.c.bf16 %v275_v29, %v275_v29  ;;  %v280_v34 = vpack.c.bf16 %v276_v30, %v276_v30 }
 0x113   :  { %v258_v35 = vpop.f32.mrf.mxu2  ;;  %v271_v36 = vpop.f32.mrf.mxu3  ;;  %551 = vmatmul.bf16.vlgmr.msrb.gmra.mxu0 %v279_v33  ;;  %564 = vmatmul.bf16.vlgmr.msrb.gmra.mxu1 %v280_v34 }
 0x114   :  { %v259_v37 = vadd.f32 %v258_v35, %v133_v31  ;;  %v272_v38 = vadd.f32 %v271_v36, %v134_v32  ;;  %v234_v39 = vpop.f32.mrf.mxu0  ;;  %v247_v40 = vpop.f32.mrf.mxu1 }
 0x116   :  { %v277_v41 = vmax.f32 %v259_v37, 0.0  ;;  %v278_v42 = vmax.f32 %v272_v38, 0.0 }
 0x118   :  { %v281_v43 = vpack.c.bf16 %v277_v41, %v277_v41  ;;  %v282_v44 = vpack.c.bf16 %v278_v42, %v278_v42 }
 0x11a   :  { %577 = vmatmul.bf16.vlgmr.msrb.gmra.mxu2 %v281_v43  ;;  %590 = vmatmul.bf16.vlgmr.msrb.gmra.mxu3 %v282_v44 }
 0x11b   :  { %v260_v45 = vpop.f32.mrf.mxu2  ;;  %v273_v46 = vpop.f32.mrf.mxu3 }
 0x190   :  { %v552_v47 = vpop.f32.mrf.mxu0  ;;  %v565_v48 = vpop.f32.mrf.mxu1 }
 0x191   :  { %v553_v50 = vadd.f32 %v871_v49, %v552_v47 }
 0x193   :  { %v566_v53 = vadd.f32 %v565_v48, %v553_v50 }
 0x198   :  { %v554_v51 = vpop.f32.mrf.mxu0  ;;  %v567_v52 = vpop.f32.mrf.mxu1 }
 0x19d   :  { %v578_v54 = vpop.f32.mrf.mxu2  ;;  %v591_v55 = vpop.f32.mrf.mxu3 }
 0x19e   :  { %v579_v56 = vadd.f32 %v578_v54, %v566_v53 }
 0x1a0   :  { %v592_v57 = vadd.f32 %v591_v55, %v579_v56 }
 0x1a2   :  { %v595_v59 = vmax.f32 %v592_v57, 0.0 }
 0x1a4   :  { %v600_v60 = vmul.f32 %v872_v58, %v595_v59 }
 0x1a5   :  { %v580_v61 = vpop.f32.mrf.mxu2  ;;  %v593_v62 = vpop.f32.mrf.mxu3 }
 0x1a6   :  { %601 = vadd.xlane.f32.xlu0 %v600_v60 }
 0x219   :  { %v602_v0 = vpop.xlane.xlu0 %601 }
 0x21a   :  { %v607_v1 = vadd.f32 %v873_v63, %v602_v0 }
 0x21c   :  { %609 = vst.msk [vmem:[%s1090_s8] sm:$0xff] %vm608_vm2, %v607_v1 }
 0x21d   :  { %614 = vsyncpa [#allocation4], 1 }
 0x21e   :  { %615 = vsyncpa [#allocation6], 1 }
 0x21f   :  { %616 = vsyncpa [#allocation9], 1 }

</bundles_post_ra>
